<compile_context>
chip_gen: v7x
topology: tpu7x:2x2x1
jax: 0.10.0
libtpu: 0.0.40
codegen_flags: <defaults>
</compile_context>

<pallas_src>
import jax
import jax.numpy as jnp
from jax.experimental import pallas as pl
from jax.experimental.pallas import tpu as pltpu


def _round_up(x, m):
    return (x + m - 1) // m * m


def se_kernel(x_ref, w1_ref, b1_ref, w2_ref, b2_ref, o_ref):
    # x_ref: (tm, Cp) native dtype; w1: (Cp, Hp); b1: (1, Hp); w2: (Hp, Cp); b2: (1, Cp)
    x = x_ref[...]
    # fc1 + ReLU (f32 accumulation on the MXU)
    h = jnp.dot(x, w1_ref[...], preferred_element_type=jnp.float32) + b1_ref[...]
    h = jnp.maximum(h, 0.0)
    # fc2 + Sigmoid
    y = jnp.dot(h, w2_ref[...], preferred_element_type=jnp.float32) + b2_ref[...]
    y = jax.nn.sigmoid(y)
    # Gate in the input's native dtype (keeps HBM/VPU traffic narrow for bf16 inputs).
    o_ref[...] = (x * y.astype(x.dtype)).astype(o_ref.dtype)


def se_layer(x, w1, b1, w2, b2, *, tm=1024, vmem_budget_bytes=20 * 1024 * 1024):
    """x: (..., C). Returns x * sigmoid(relu(x @ w1 + b1) @ w2 + b2), same shape/dtype.

    w1: (C, H), b1: (1, H), w2: (H, C), b2: (1, C)   (H = C // reduction).
    """
    orig_shape = x.shape
    C = orig_shape[-1]
    H = w1.shape[1]
    x2d = x.reshape(-1, C)
    M = x2d.shape[0]
    itemsize = jnp.dtype(x.dtype).itemsize

    # ---- lane-dense packing: present a >=128-wide last dim to the DMA/store path.
    # With C=64 every store would otherwise be a masked half-vreg vst.msk.
    if C < 128 and 128 % C == 0:
        f = 128 // C
        w1 = jnp.kron(jnp.eye(f, dtype=w1.dtype), w1)   # (f*C, f*H) block-diagonal
        w2 = jnp.kron(jnp.eye(f, dtype=w2.dtype), w2)   # (f*H, f*C) block-diagonal
        b1 = jnp.tile(b1, (1, f))
        b2 = jnp.tile(b2, (1, f))
    else:
        f = 1
    Cp, Hp = f * C, f * H

    # ---- choose the row tile over the packed slab (packed rows = ceil(M / f)).
    sub = 8 * (4 // itemsize)                 # sublane multiple: 8 f32, 16 bf16, 32 i8
    mp_needed = pl.cdiv(M, f)
    # VMEM guard (v7x only has 64 MiB): in + out double-buffered in native dtype,
    # plus f32 intermediates (h pads to >=128 lanes, y is Cp wide).
    bytes_per_row = 4 * Cp * itemsize + 4 * (Cp + max(Hp, 128))
    tm_cap = max(sub, (vmem_budget_bytes // bytes_per_row) // sub * sub)
    tm_eff = min(_round_up(min(tm, tm_cap), sub), _round_up(mp_needed, sub))
    mp_pad = _round_up(mp_needed, tm_eff)
    # Keep both v7x TensorCores busy: prefer >=2 grid steps when there is enough work.
    if mp_pad // tm_eff < 2 and mp_needed > 2 * sub:
        tm_eff = _round_up(pl.cdiv(mp_needed, 2), sub)
        mp_pad = _round_up(mp_needed, tm_eff)

    # ---- zero-pad rows so any M works without shrinking the tile, then pack.
    m_pad = mp_pad * f
    if m_pad != M:
        x2d = jnp.pad(x2d, ((0, m_pad - M), (0, 0)))
    xp = x2d.reshape(mp_pad, Cp)

    out = pl.pallas_call(
        se_kernel,
        out_shape=jax.ShapeDtypeStruct((mp_pad, Cp), x.dtype),
        grid_spec=pltpu.PrefetchScalarGridSpec(
            num_scalar_prefetch=0,
            grid=(mp_pad // tm_eff,),
            in_specs=[
                pl.BlockSpec((tm_eff, Cp), lambda i: (i, 0)),   # x tile
                pl.BlockSpec((Cp, Hp), lambda i: (0, 0)),       # w1 (full, revisit-invariant)
                pl.BlockSpec((1, Hp), lambda i: (0, 0)),        # b1
                pl.BlockSpec((Hp, Cp), lambda i: (0, 0)),       # w2
                pl.BlockSpec((1, Cp), lambda i: (0, 0)),        # b2
            ],
            out_specs=pl.BlockSpec((tm_eff, Cp), lambda i: (i, 0)),
        ),
        compiler_params=pltpu.CompilerParams(
            dimension_semantics=("parallel",),     # megacore sharding of the M axis
            vmem_limit_bytes=32 * 1024 * 1024,     # explicit: covers v5e's 16 MiB default
        ),
    )(xp, w1, b1, w2, b2)

    out = out.reshape(m_pad, C)[:M]
    return out.reshape(orig_shape)


def init_se_params(key, channel, reduction=16, dtype=jnp.float32):
    """Deterministic init mirroring nn.Linear default (uniform +-1/sqrt(fan_in)).

    Weights returned pre-transposed to (in, out) layout for the kernel.
    """
    hidden = channel // reduction
    k1, k2, k3, k4 = jax.random.split(key, 4)
    bound1 = 1.0 / (channel ** 0.5)
    bound2 = 1.0 / (hidden ** 0.5)
    w1 = jax.random.uniform(k1, (channel, hidden), dtype, -bound1, bound1)  # fc1 weight^T
    b1 = jax.random.uniform(k2, (1, hidden), dtype, -bound1, bound1)
    w2 = jax.random.uniform(k3, (hidden, channel), dtype, -bound2, bound2)  # fc2 weight^T
    b2 = jax.random.uniform(k4, (1, channel), dtype, -bound2, bound2)
    return w1, b1, w2, b2


def se_layer_ref(x, w1, b1, w2, b2):
    h = jnp.maximum(x @ w1 + b1[0], 0.0)
    y = jax.nn.sigmoid(h @ w2 + b2[0])
    return x * y


if __name__ == "__main__":
    key = jax.random.PRNGKey(0)
    kx, kp = jax.random.split(key)

    # channel must be divisible by reduction=16 (hidden = 4)
    B, S, C = 2, 8, 64
    x = jax.random.normal(kx, (B, S, C), dtype=jnp.float32)
    w1, b1, w2, b2 = init_se_params(kp, C, reduction=16)

    out = se_layer(x, w1, b1, w2, b2)
    out = jax.block_until_ready(out)

    ref = se_layer_ref(x, w1, b1, w2, b2)
    assert out.shape == x.shape and out.dtype == x.dtype
    assert jnp.allclose(out, ref, atol=1e-5, rtol=1e-5)

    print("KERNEL_OK")
</pallas_src>

<mosaic_0001>
module attributes {stable_mosaic.version = 11 : i64} {
  func.func @se_kernel(%arg0: i32, %arg1: memref<8x128xf32, #tpu.memory_space<vmem>>, %arg2: memref<128x8xf32, #tpu.memory_space<vmem>>, %arg3: memref<1x8xf32, #tpu.memory_space<vmem>>, %arg4: memref<8x128xf32, #tpu.memory_space<vmem>>, %arg5: memref<1x128xf32, #tpu.memory_space<vmem>>, %arg6: memref<8x128xf32, #tpu.memory_space<vmem>>) attributes {dimension_semantics = [#tpu.dimension_semantics<parallel>], iteration_bounds = array<i64: 1>, scalar_prefetch = 0 : i64, scratch_operands = 0 : i64, tpu.core_type = #tpu.core_type<tc>, window_params = [{transform_indices = @transform_0, window_bounds = array<i64: 8, 128>}, {pipeline_mode = #tpu.pipeline_mode<synchronous>, transform_indices = @transform_1, window_bounds = array<i64: 128, 8>}, {pipeline_mode = #tpu.pipeline_mode<synchronous>, transform_indices = @transform_2, window_bounds = array<i64: 1, 8>}, {pipeline_mode = #tpu.pipeline_mode<synchronous>, transform_indices = @transform_3, window_bounds = array<i64: 8, 128>}, {pipeline_mode = #tpu.pipeline_mode<synchronous>, transform_indices = @transform_4, window_bounds = array<i64: 1, 128>}, {transform_indices = @transform_5, window_bounds = array<i64: 8, 128>}]} {
    %c0 = arith.constant 0 : index
    %c0_0 = arith.constant 0 : index
    %0 = vector.load %arg1[%c0, %c0_0] : memref<8x128xf32, #tpu.memory_space<vmem>>, vector<8x128xf32>
    %c0_1 = arith.constant 0 : index
    %c0_2 = arith.constant 0 : index
    %1 = vector.load %arg2[%c0_1, %c0_2] : memref<128x8xf32, #tpu.memory_space<vmem>>, vector<128x8xf32>
    %cst = arith.constant dense<0.000000e+00> : vector<8x8xf32>
    %2 = tpu.matmul %0, %1, %cst {dimension_numbers = #tpu.dot_dimension_numbers<[1], [0], [0], [1], [0, 0, 1, 1], [], []>} : vector<8x128xf32>, vector<128x8xf32>, vector<8x8xf32> -> vector<8x8xf32>
    %c0_3 = arith.constant 0 : index
    %c0_4 = arith.constant 0 : index
    %3 = vector.load %arg3[%c0_3, %c0_4] : memref<1x8xf32, #tpu.memory_space<vmem>>, vector<1x8xf32>
    %4 = vector.broadcast %3 : vector<1x8xf32> to vector<8x8xf32>
    %5 = arith.addf %2, %4 : vector<8x8xf32>
    %cst_5 = arith.constant 0.000000e+00 : f32
    %6 = vector.broadcast %cst_5 : f32 to vector<8x8xf32>
    %7 = arith.maximumf %5, %6 : vector<8x8xf32>
    %c0_6 = arith.constant 0 : index
    %c0_7 = arith.constant 0 : index
    %8 = vector.load %arg4[%c0_6, %c0_7] : memref<8x128xf32, #tpu.memory_space<vmem>>, vector<8x128xf32>
    %cst_8 = arith.constant dense<0.000000e+00> : vector<8x128xf32>
    %9 = tpu.matmul %7, %8, %cst_8 {dimension_numbers = #tpu.dot_dimension_numbers<[1], [0], [0], [1], [0, 0, 1, 1], [], []>} : vector<8x8xf32>, vector<8x128xf32>, vector<8x128xf32> -> vector<8x128xf32>
    %c0_9 = arith.constant 0 : index
    %c0_10 = arith.constant 0 : index
    %10 = vector.load %arg5[%c0_9, %c0_10] : memref<1x128xf32, #tpu.memory_space<vmem>>, vector<1x128xf32>
    %11 = vector.broadcast %10 : vector<1x128xf32> to vector<8x128xf32>
    %12 = arith.addf %9, %11 : vector<8x128xf32>
    %13 = arith.negf %12 : vector<8x128xf32>
    %14 = math.exp %13 : vector<8x128xf32>
    %cst_11 = arith.constant 1.000000e+00 : f32
    %15 = vector.broadcast %cst_11 : f32 to vector<8x128xf32>
    %16 = arith.addf %15, %14 : vector<8x128xf32>
    %17 = arith.divf %15, %16 : vector<8x128xf32>
    %18 = arith.mulf %0, %17 : vector<8x128xf32>
    %c0_12 = arith.constant 0 : index
    %c0_13 = arith.constant 0 : index
    %19 = vector.load %arg6[%c0_12, %c0_13] : memref<8x128xf32, #tpu.memory_space<vmem>>, vector<8x128xf32>
    tpu.vector_store %arg6[%c0_12, %c0_13], %18 {strides = array<i32>} : memref<8x128xf32, #tpu.memory_space<vmem>>, vector<8x128xf32>,
    return
  }
  func.func @transform_0(%arg0: i32) -> (i32, i32) {
    %c0_i32 = arith.constant 0 : i32
    %c0_i32_0 = arith.constant 0 : i32
    return %arg0, %c0_i32 : i32, i32
  }
  func.func @transform_1(%arg0: i32) -> (i32, i32) {
    %c0_i32 = arith.constant 0 : i32
    %c0_i32_0 = arith.constant 0 : i32
    %c0_i32_1 = arith.constant 0 : i32
    return %c0_i32, %c0_i32_0 : i32, i32
  }
  func.func @transform_2(%arg0: i32) -> (i32, i32) {
    %c0_i32 = arith.constant 0 : i32
    %c0_i32_0 = arith.constant 0 : i32
    %c0_i32_1 = arith.constant 0 : i32
    return %c0_i32, %c0_i32_0 : i32, i32
  }
  func.func @transform_3(%arg0: i32) -> (i32, i32) {
    %c0_i32 = arith.constant 0 : i32
    %c0_i32_0 = arith.constant 0 : i32
    %c0_i32_1 = arith.constant 0 : i32
    return %c0_i32, %c0_i32_0 : i32, i32
  }
  func.func @transform_4(%arg0: i32) -> (i32, i32) {
    %c0_i32 = arith.constant 0 : i32
    %c0_i32_0 = arith.constant 0 : i32
    %c0_i32_1 = arith.constant 0 : i32
    return %c0_i32, %c0_i32_0 : i32, i32
  }
  func.func @transform_5(%arg0: i32) -> (i32, i32) {
    %c0_i32 = arith.constant 0 : i32
    %c0_i32_0 = arith.constant 0 : i32
    return %arg0, %c0_i32 : i32, i32
  }
}

</mosaic_0001>

<bundles_post_ra>
// kernel: tpu_custom_call.1
= control target key start
LH: loop header
LB: loop body
LE: loop exit
PB: predicated region body
PF: predicated region fallthrough
CT: control target
= control target key end

     0   :  { %v339_v3 = vmov 0.0|0.0   ;;  %vm340_vm0 = vmmov 0   ;;  %v341_v6 = vmov 0.0   ;;  %s445_s0 = inlined_call_operand.vmem [shape: f32[8,128], index: 0, kind: input, shape index: {}]   ;;  %s446_s1 = inlined_call_operand.vmem [shape: f32[128,8], index: 1, kind: input, shape index: {}]   ;;  %s447_s2 = inlined_call_operand.vmem [shape: f32[1,8], index: 2, kind: input, shape index: {}]   ;;  %s448_s3 = inlined_call_operand.vmem [shape: f32[8,128], index: 3, kind: input, shape index: {}]   ;;  %s449_s4 = inlined_call_operand.vmem [shape: f32[1,128], index: 4, kind: input, shape index: {}]   ;;  %s450_s5 = inlined_call_operand.hbm [shape: f32[8,128], index: 5, kind: output, shape index: {}]  }
   0x1   :  { %v22_v0 = vld [vmem:[%s446_s1] sm:$0xff]  ;;  %v23_v1 = vld [vmem:[%s446_s1 + $0x8] sm:$0xff]  ;;  %v24_v2 = vld [vmem:[%s446_s1 + $0x10] sm:$0xff]  ;;  %283 = vmatprep.subr.bf16.mxu0 %v339_v3  ;;  %275 = vmatprep.mubr.msk.f32.mxu0 %vm340_vm0, %v341_v6 }
   0x2   :  { %v284_v4 = vpack.c.bf16 %v23_v1, %v22_v0  ;;  %v25_v5 = vld [vmem:[%s446_s1 + $0x18] sm:$0xff]  ;;  %278 = vmatprep.subr.mxu1 %v341_v6  ;;  %280 = vmatprep.mubr.msk.f32.mxu1 %vm340_vm0, %v341_v6  ;;  %v26_v8 = vld [vmem:[%s446_s1 + $0x20] sm:$0xff]  ;;  %v27_v9 = vld [vmem:[%s446_s1 + $0x28] sm:$0xff] }
   0x3   :  { %v287_v7 = vpack.c.bf16 %v25_v5, %v24_v2 }
   0x4   :  { %285 = vmatpush3.bf16.msra.mxu0 %v284_v4 }
   0x5   :  { %286 = vmatprep.subr.bf16.mxu0 %v339_v3 }
   0x6   :  { %10 = vsyncpa [#allocation3], 0  ;;  %v290_v10 = vpack.c.bf16 %v27_v9, %v26_v8  ;;  %v28_v11 = vld [vmem:[%s446_s1 + $0x30] sm:$0xff]  ;;  %v29_v12 = vld [vmem:[%s446_s1 + $0x38] sm:$0xff]  ;;  %vm124_vm1 = vcmask 64512  }
   0x7   :  { %v293_v13 = vpack.c.bf16 %v29_v12, %v28_v11  ;;  %v30_v14 = vld [vmem:[%s446_s1 + $0x40] sm:$0xff]  ;;  %v31_v15 = vld [vmem:[%s446_s1 + $0x48] sm:$0xff]  ;;  %v32_v17 = vld [vmem:[%s446_s1 + $0x50] sm:$0xff] }
   0x8   :  { %288 = vmatpush3.bf16.msra.mxu0 %v287_v7  ;;  %v296_v16 = vpack.c.bf16 %v31_v15, %v30_v14  ;;  %v33_v18 = vld [vmem:[%s446_s1 + $0x58] sm:$0xff]  ;;  %v34_v20 = vld [vmem:[%s446_s1 + $0x60] sm:$0xff]  ;;  %v35_v21 = vld [vmem:[%s446_s1 + $0x68] sm:$0xff] }
   0x9   :  { %289 = vmatprep.subr.bf16.mxu0 %v339_v3  ;;  %v299_v19 = vpack.c.bf16 %v33_v18, %v32_v17  ;;  %v302_v22 = vpack.c.bf16 %v35_v21, %v34_v20  ;;  %v36_v23 = vld [vmem:[%s446_s1 + $0x70] sm:$0xff]  ;;  %v37_v24 = vld [vmem:[%s446_s1 + $0x78] sm:$0xff]  ;;  %v21_v26 = vld [vmem:[%s445_s0] sm:$0xff]  ;;  %s342_s0 = smov [#allocation2]  }
   0xa   :  { %v305_v25 = vpack.c.bf16 %v37_v24, %v36_v23  ;;  %v116_v27 = vld [vmem:[%s448_s3] sm:$0xff] }
   0xb   :  { %279 = vmatpush3.msra.mxu1 %v116_v27  ;;  %v220_v28 = vld [vmem:[%s447_s2] ss:$0 sm:$0xff]  ;;  %s212_s2 = sshll.u32 %s342_s0, 4  ;;  %s213_s2 = int_to_ptr.vmem [resolvable:$true] %s212_s2 }
   0xc   :  { %291 = vmatpush3.bf16.msra.mxu0 %v290_v10  ;;  %v221_v33 = vld [vmem:[%s449_s4] ss:$0 sm:$0xff]  ;;  %s315_s3 = scalar_lea.vmem %s213_s2, 128  ;;  %p320_p1 = scmp.lt.s32.totalorder %s213_s2, %s213_s2 }
   0xd   :  { %292 = vmatprep.subr.bf16.mxu0 %v339_v3  ;;  %p316_p0 = scmp.ne.s32.totalorder %s213_s2, %s315_s3  ;;  %p321_p2 = scmp.lt.s32.totalorder %s315_s3, %s315_s3 }
   0xf   :  { %p322_p3 = por %p321_p2, %p320_p1 }
  0x10   :  { %294 = vmatpush3.bf16.msra.mxu0 %v293_v13 }
  0x11   :  { %295 = vmatprep.subr.bf16.mxu0 %v339_v3  ;;  %p323_p4 = pnand %p322_p3, %p316_p0 }
  0x14   :  { %297 = vmatpush3.bf16.msra.mxu0 %v296_v16 }
  0x15   :  { %298 = vmatprep.subr.bf16.mxu0 %v339_v3 }
  0x18   :  { %300 = vmatpush3.bf16.msra.mxu0 %v299_v19 }
  0x19   :  { %301 = vmatprep.subr.bf16.mxu0 %v339_v3 }
  0x1c   :  { %303 = vmatpush3.bf16.msra.mxu0 %v302_v22 }
  0x1d   :  { %304 = vmatprep.subr.bf16.mxu0 %v339_v3 }
  0x20   :  { %306 = vmatpush3.bf16.msra.mxu0 %v305_v25 }
  0x23   :  { %276 = vmatmul.mubr.f32.vlgmr.msra.gmra.mrb[0].mxu0 %v21_v26 }
  0xf6   :  { %v111_v29 = vpop.f32.mrb[0].mxu0 }
  0xf7   :  { %v112_v30 = vadd.f32 %v220_v28, %v111_v29  ;;  %v277_v31 = vpop.f32.mrb[1].mxu0 }
  0xf9   :  { %v115_v32 = vmax.f32 %v112_v30, 0.0 }
  0xfb   :  { %281 = vmatmul.mubr.msk.f32.vlgmr.msra.gmra.mrb[0].mxu1 %vm124_vm1, %v115_v32 }
 0x1ce   :  { %v194_v34 = vpop.f32.mrb[0].mxu1 }
 0x1cf   :  { %v195_v35 = vadd.f32 %v221_v33, %v194_v34  ;;  %v282_v36 = vpop.f32.mrb[1].mxu1 }
 0x1d1   :  { %v223_v37 = vmul.f32 -1.442695, %v195_v35 }
 0x1d3   :  { %311 = vpow2.f32 %v223_v37 }
 0x1dd   :  { %v312_v38 = vpop.eup %311 }
 0x1de   :  { %v201_v39 = vadd.f32 1.0, %v312_v38 }
 0x1e0   :  { %313 = vrcp.f32 %v201_v39 }
 0x1ea   :  { %v314_v40 = vpop.eup %313 }
 0x1eb   :  { %v204_v41 = vmul.f32 %v314_v40, %v21_v26 }
 0x1ed   :  { %205 = vst [vmem:[#allocation2] sm:$0xff] %v204_v41 }
 0x1ee   :  { %326 = shalt.err (!%p323_p4)
}
 0x1ef   :  { %s327_s8 = scalar_lea.hbm %s450_s5, 128 }
 0x1f0   :  { %p328_p5 = scmp.ne.s32.totalorder %s450_s5, %s327_s8  ;;  %p331_p6 = scmp.lt.u32.totalorder %s327_s8, %s450_s5 }
 0x1f2   :  { %p333_p7 = pnand %p331_p6, %p328_p5 }
 0x1f4   :  { %336 = shalt.err (!%p333_p7)
}
 0x1f5   :  { %215 = dma.vmem_to_hbm [thread:$0]  %s213_s2, 128, %s450_s5, [#allocation3]  }
 0x1f6   :  { %337 = dma.done.wait [#allocation3], 128  }
 0x1f7   :  { %338 = vsyncadd [#allocation3], 4294967168 }
 0x1f8   :  { %219 = vsyncpa [#allocation3], 1 }

</bundles_post_ra>
